<compile_context>
chip_gen: v7x
topology: tpu7x:2x2x1
jax: 0.10.0
libtpu: 0.0.40
codegen_flags: <defaults>
</compile_context>

<pallas_src>
import functools

import jax
import jax.numpy as jnp
from jax.experimental import pallas as pl
from jax.experimental.pallas import tpu as pltpu

# ---------------------------------------------------------------------------
# Model dimensions (match the PyTorch module defaults).
# ---------------------------------------------------------------------------
NUM_EMOTIONS = 9
EMO_DIM = 128
PROSODY_DIM = 3
TEXT_IN_DIM = 300
TEXT_ENC_DIM = 256
HIDDEN_DIM = 256
MEL_DIM = 80


def _round_up(x, m):
    return (x + m - 1) // m * m


# ---------------------------------------------------------------------------
# Fused kernel: one (batch, time-tile) block of the whole forward pass.
# ---------------------------------------------------------------------------
def _synth_kernel(x_ref, bias_ref, wf_ref, wm_ref, bm_ref, out_ref):
    # x_ref:    [1, TILE_T, 300]        input text features (compute dtype)
    # bias_ref: [1, 1, HIDDEN_DIM]      per-batch fused hidden bias (f32)
    # wf_ref:   [300, HIDDEN_DIM]       fused W_text @ W_hid_text
    # wm_ref:   [HIDDEN_DIM, MEL_DIM]   mel projection weight
    # bm_ref:   [1, MEL_DIM]            mel bias (f32)
    # out_ref:  [1, TILE_T, MEL_DIM]    f32 output
    x = x_ref[0]                                                     # (TILE_T, 300)

    h = jnp.dot(x, wf_ref[...], preferred_element_type=jnp.float32)  # (TILE_T, 256)
    h = jnp.maximum(h + bias_ref[0], 0.0)

    mel = jnp.dot(h.astype(wm_ref.dtype), wm_ref[...],
                  preferred_element_type=jnp.float32)                # (TILE_T, 80)
    out_ref[0] = (mel + bm_ref[...]).astype(out_ref.dtype)


# ---------------------------------------------------------------------------
# Parameters (same parameterization as the PyTorch module).
# ---------------------------------------------------------------------------
def init_params(key):
    ks = jax.random.split(key, 8)
    scale = 0.05
    return {
        "w_text": scale * jax.random.normal(ks[0], (TEXT_IN_DIM, TEXT_ENC_DIM), jnp.float32),
        "b_text": scale * jax.random.normal(ks[1], (1, TEXT_ENC_DIM), jnp.float32),
        "emb_table": scale * jax.random.normal(ks[2], (NUM_EMOTIONS, EMO_DIM), jnp.float32),
        "w_pros": scale * jax.random.normal(ks[3], (EMO_DIM, PROSODY_DIM), jnp.float32),
        "b_pros": scale * jax.random.normal(ks[4], (1, PROSODY_DIM), jnp.float32),
        "w_hid": scale * jax.random.normal(ks[5], (TEXT_ENC_DIM + PROSODY_DIM, HIDDEN_DIM), jnp.float32),
        "b_hid": jnp.zeros((1, HIDDEN_DIM), jnp.float32),
        "w_mel": scale * jax.random.normal(ks[6], (HIDDEN_DIM, MEL_DIM), jnp.float32),
        "b_mel": scale * jax.random.normal(ks[7], (1, MEL_DIM), jnp.float32),
    }


# ---------------------------------------------------------------------------
# Wrapper: offline algebraic folding + pallas_call over a (batch, T-tile) grid.
# ---------------------------------------------------------------------------
@functools.partial(jax.jit, static_argnames=("tile_t", "compute_dtype"))
def emo_tortoise_forward(params, text_inputs, emotion_indices, *,
                         tile_t=None, compute_dtype=jnp.float32):
    """text_inputs: [B, T, 300] float32; emotion_indices: [B] int32.
    Returns mel_spectrogram: [B, T, MEL_DIM] float32."""
    B, T, F = text_inputs.shape
    assert F == TEXT_IN_DIM

    # ---- exact offline folding of the linear chain (tiny XLA ops) -----------
    w_hid_text = params["w_hid"][:TEXT_ENC_DIM, :]                   # [256, 256]
    w_hid_pros = params["w_hid"][TEXT_ENC_DIM:, :]                   # [3, 256]

    # W_text @ W_hid_text : one [300,256] weight replaces two per-row matmuls.
    w_fused = (params["w_text"] @ w_hid_text).astype(compute_dtype)  # [300, 256]
    hidden_base = params["b_text"] @ w_hid_text + params["b_hid"]    # [1, 256]

    # Per-emotion hidden bias table (kills the K=9 / M=3 / K=3 MXU passes).
    emo_bias = (params["emb_table"] @ params["w_pros"] + params["b_pros"]) @ w_hid_pros
    emo_bias = emo_bias + hidden_base                                # [9, 256]
    batch_bias = emo_bias[emotion_indices][:, None, :]               # [B, 1, 256] f32

    w_mel = params["w_mel"].astype(compute_dtype)                    # [256, 80]
    b_mel = params["b_mel"]                                          # [1, 80] f32

    x = text_inputs.astype(compute_dtype)                            # [B, T, 300] (no copy for f32)

    # ---- time-axis tiling ----------------------------------------------------
    # tile_t == T  -> single block (allowed: block dim == full dim).
    # tile_t <  T  -> multiple of 8; Pallas masks the partial last block.
    if tile_t is None:
        tile_t = 512
    if tile_t < T:
        tile_t = _round_up(tile_t, 8)
    if tile_t >= T:
        tile_t = T

    grid = (B, pl.cdiv(T, tile_t))

    out = pl.pallas_call(
        _synth_kernel,
        out_shape=jax.ShapeDtypeStruct((B, T, MEL_DIM), jnp.float32),
        grid_spec=pltpu.PrefetchScalarGridSpec(
            num_scalar_prefetch=0,
            grid=grid,
            in_specs=[
                pl.BlockSpec((1, tile_t, TEXT_IN_DIM), lambda b, t: (b, t, 0)),   # x tile
                pl.BlockSpec((1, 1, HIDDEN_DIM), lambda b, t: (b, 0, 0)),         # per-batch bias
                pl.BlockSpec((TEXT_IN_DIM, HIDDEN_DIM), lambda b, t: (0, 0)),     # fused weight
                pl.BlockSpec((HIDDEN_DIM, MEL_DIM), lambda b, t: (0, 0)),         # mel weight
                pl.BlockSpec((1, MEL_DIM), lambda b, t: (0, 0)),                  # mel bias
            ],
            out_specs=pl.BlockSpec((1, tile_t, MEL_DIM), lambda b, t: (b, t, 0)),
        ),
        compiler_params=pltpu.CompilerParams(
            # Rows are fully independent: both grid axes are parallel so v7x's
            # 2 TensorCores split the work; harmless no-op on v5e/v6e.
            dimension_semantics=("parallel", "parallel"),
            # Comfortable headroom for large tile_t sweeps; within every chip's
            # physical VMEM (incl. v7x's 64 MiB).
            vmem_limit_bytes=32 * 1024 * 1024,
        ),
    )(x, batch_bias, w_fused, w_mel, b_mel)

    return out


# ---------------------------------------------------------------------------
# Pure-JAX reference mirroring the original (unfused) module.
# ---------------------------------------------------------------------------
def reference_forward(params, text_inputs, emotion_indices):
    B, T, _ = text_inputs.shape
    tf = text_inputs.astype(jnp.float32) @ params["w_text"] + params["b_text"]   # [B,T,256]
    emo = params["emb_table"][emotion_indices]                                    # [B,128]
    pros = emo @ params["w_pros"] + params["b_pros"]                              # [B,3]
    pros = jnp.broadcast_to(pros[:, None, :], (B, T, PROSODY_DIM))
    cat = jnp.concatenate([tf, pros], axis=-1)                                    # [B,T,259]
    h = jnp.maximum(cat @ params["w_hid"] + params["b_hid"], 0.0)
    return h @ params["w_mel"] + params["b_mel"]


if __name__ == "__main__":
    key = jax.random.PRNGKey(0)
    k_param, k_text, k_emo = jax.random.split(key, 3)
    params = init_params(k_param)

    # Case 1: small shape (batch=2, seq=8, text feature dim fixed at 300).
    B, T = 2, 8
    text_inputs = jax.random.normal(k_text, (B, T, TEXT_IN_DIM), jnp.float32)
    emotion_indices = jax.random.randint(k_emo, (B,), 0, NUM_EMOTIONS, jnp.int32)

    mel = jax.block_until_ready(emo_tortoise_forward(params, text_inputs, emotion_indices))
    ref = reference_forward(params, text_inputs, emotion_indices)
    assert mel.shape == (B, T, MEL_DIM), mel.shape
    assert jnp.allclose(mel, ref, atol=1e-4, rtol=1e-4), float(jnp.max(jnp.abs(mel - ref)))

    # Case 2: ragged T with a small explicit tile -> multi-block grid including a
    # partial last T-block (exercises the masked-writeback / pipelining path).
    B2, T2 = 2, 20
    ti2 = jax.random.normal(jax.random.PRNGKey(1), (B2, T2, TEXT_IN_DIM), jnp.float32)
    ei2 = jax.random.randint(jax.random.PRNGKey(2), (B2,), 0, NUM_EMOTIONS, jnp.int32)
    mel2 = jax.block_until_ready(emo_tortoise_forward(params, ti2, ei2, tile_t=8))
    ref2 = reference_forward(params, ti2, ei2)
    assert mel2.shape == (B2, T2, MEL_DIM), mel2.shape
    assert jnp.allclose(mel2, ref2, atol=1e-4, rtol=1e-4), float(jnp.max(jnp.abs(mel2 - ref2)))

    print("KERNEL_OK")
</pallas_src>

<mosaic_0001>
module attributes {stable_mosaic.version = 11 : i64} {
  func.func @_synth_kernel(%arg0: i32, %arg1: i32, %arg2: memref<1x8x300xf32, #tpu.memory_space<vmem>>, %arg3: memref<1x1x256xf32, #tpu.memory_space<vmem>>, %arg4: memref<300x256xf32, #tpu.memory_space<vmem>>, %arg5: memref<256x80xf32, #tpu.memory_space<vmem>>, %arg6: memref<1x80xf32, #tpu.memory_space<vmem>>, %arg7: memref<1x8x80xf32, #tpu.memory_space<vmem>>) attributes {dimension_semantics = [#tpu.dimension_semantics<parallel>, #tpu.dimension_semantics<parallel>], iteration_bounds = array<i64: 2, 1>, scalar_prefetch = 0 : i64, scratch_operands = 0 : i64, tpu.core_type = #tpu.core_type<tc>, window_params = [{transform_indices = @transform_0, window_bounds = array<i64: 1, 8, 300>}, {transform_indices = @transform_1, window_bounds = array<i64: 1, 1, 256>}, {pipeline_mode = #tpu.pipeline_mode<synchronous>, transform_indices = @transform_2, window_bounds = array<i64: 300, 256>}, {pipeline_mode = #tpu.pipeline_mode<synchronous>, transform_indices = @transform_3, window_bounds = array<i64: 256, 80>}, {pipeline_mode = #tpu.pipeline_mode<synchronous>, transform_indices = @transform_4, window_bounds = array<i64: 1, 80>}, {transform_indices = @transform_5, window_bounds = array<i64: 1, 8, 80>}]} {
    %c0 = arith.constant 0 : index
    %c0_0 = arith.constant 0 : index
    %c0_1 = arith.constant 0 : index
    %0 = vector.load %arg2[%c0, %c0_0, %c0_1] : memref<1x8x300xf32, #tpu.memory_space<vmem>>, vector<1x8x300xf32>
    %1 = vector.shape_cast %0 : vector<1x8x300xf32> to vector<8x300xf32>
    %c0_2 = arith.constant 0 : index
    %c0_3 = arith.constant 0 : index
    %2 = vector.load %arg4[%c0_2, %c0_3] : memref<300x256xf32, #tpu.memory_space<vmem>>, vector<300x256xf32>
    %cst = arith.constant dense<0.000000e+00> : vector<8x256xf32>
    %3 = tpu.matmul %1, %2, %cst {dimension_numbers = #tpu.dot_dimension_numbers<[1], [0], [0], [1], [0, 0, 1, 1], [], []>} : vector<8x300xf32>, vector<300x256xf32>, vector<8x256xf32> -> vector<8x256xf32>
    %c0_4 = arith.constant 0 : index
    %c0_5 = arith.constant 0 : index
    %c0_6 = arith.constant 0 : index
    %4 = vector.load %arg3[%c0_4, %c0_5, %c0_6] : memref<1x1x256xf32, #tpu.memory_space<vmem>>, vector<1x1x256xf32>
    %5 = vector.shape_cast %4 : vector<1x1x256xf32> to vector<1x256xf32>
    %6 = vector.broadcast %5 : vector<1x256xf32> to vector<8x256xf32>
    %7 = arith.addf %3, %6 : vector<8x256xf32>
    %cst_7 = arith.constant 0.000000e+00 : f32
    %8 = vector.broadcast %cst_7 : f32 to vector<8x256xf32>
    %9 = arith.maximumf %7, %8 : vector<8x256xf32>
    %c0_8 = arith.constant 0 : index
    %c0_9 = arith.constant 0 : index
    %10 = vector.load %arg5[%c0_8, %c0_9] : memref<256x80xf32, #tpu.memory_space<vmem>>, vector<256x80xf32>
    %cst_10 = arith.constant dense<0.000000e+00> : vector<8x80xf32>
    %11 = tpu.matmul %9, %10, %cst_10 {dimension_numbers = #tpu.dot_dimension_numbers<[1], [0], [0], [1], [0, 0, 1, 1], [], []>} : vector<8x256xf32>, vector<256x80xf32>, vector<8x80xf32> -> vector<8x80xf32>
    %c0_11 = arith.constant 0 : index
    %c0_12 = arith.constant 0 : index
    %12 = vector.load %arg6[%c0_11, %c0_12] : memref<1x80xf32, #tpu.memory_space<vmem>>, vector<1x80xf32>
    %13 = vector.broadcast %12 : vector<1x80xf32> to vector<8x80xf32>
    %14 = arith.addf %11, %13 : vector<8x80xf32>
    %c0_13 = arith.constant 0 : index
    %c0_14 = arith.constant 0 : index
    %c0_15 = arith.constant 0 : index
    %15 = vector.load %arg7[%c0_13, %c0_14, %c0_15] : memref<1x8x80xf32, #tpu.memory_space<vmem>>, vector<1x8x80xf32>
    %16 = vector.shape_cast %15 : vector<1x8x80xf32> to vector<8x80xf32>
    %17 = vector.shape_cast %14 : vector<8x80xf32> to vector<1x8x80xf32>
    tpu.vector_store %arg7[%c0_13, %c0_14, %c0_15], %17 {strides = array<i32>} : memref<1x8x80xf32, #tpu.memory_space<vmem>>, vector<1x8x80xf32>,
    return
  }
  func.func @transform_0(%arg0: i32, %arg1: i32) -> (i32, i32, i32) {
    %c0_i32 = arith.constant 0 : i32
    %c0_i32_0 = arith.constant 0 : i32
    return %arg0, %arg1, %c0_i32 : i32, i32, i32
  }
  func.func @transform_1(%arg0: i32, %arg1: i32) -> (i32, i32, i32) {
    %c0_i32 = arith.constant 0 : i32
    %c0_i32_0 = arith.constant 0 : i32
    %c0_i32_1 = arith.constant 0 : i32
    return %arg0, %c0_i32, %c0_i32_0 : i32, i32, i32
  }
  func.func @transform_2(%arg0: i32, %arg1: i32) -> (i32, i32) {
    %c0_i32 = arith.constant 0 : i32
    %c0_i32_0 = arith.constant 0 : i32
    %c0_i32_1 = arith.constant 0 : i32
    return %c0_i32, %c0_i32_0 : i32, i32
  }
  func.func @transform_3(%arg0: i32, %arg1: i32) -> (i32, i32) {
    %c0_i32 = arith.constant 0 : i32
    %c0_i32_0 = arith.constant 0 : i32
    %c0_i32_1 = arith.constant 0 : i32
    return %c0_i32, %c0_i32_0 : i32, i32
  }
  func.func @transform_4(%arg0: i32, %arg1: i32) -> (i32, i32) {
    %c0_i32 = arith.constant 0 : i32
    %c0_i32_0 = arith.constant 0 : i32
    %c0_i32_1 = arith.constant 0 : i32
    return %c0_i32, %c0_i32_0 : i32, i32
  }
  func.func @transform_5(%arg0: i32, %arg1: i32) -> (i32, i32, i32) {
    %c0_i32 = arith.constant 0 : i32
    %c0_i32_0 = arith.constant 0 : i32
    return %arg0, %arg1, %c0_i32 : i32, i32, i32
  }
}

</mosaic_0001>

<bundles_post_ra>
// kernel: emo_tortoise_forward.1
= control target key start
LH: loop header
LB: loop body
LE: loop exit
PB: predicated region body
PF: predicated region fallthrough
CT: control target
= control target key end

     0   :  { %10 = vsyncpa [#allocation3], 0  ;;  %s1526_s0 = inlined_call_operand.vmem [shape: f32[2,8,300], index: 0, kind: input, shape index: {}]   ;;  %s1527_s1 = inlined_call_operand.vmem [shape: f32[2,1,256], index: 1, kind: input, shape index: {}]   ;;  %s1528_s2 = inlined_call_operand.vmem [shape: f32[300,256], index: 2, kind: input, shape index: {}]   ;;  %s1529_s3 = inlined_call_operand.vmem [shape: f32[256,80], index: 3, kind: input, shape index: {}]   ;;  %s1530_s4 = inlined_call_operand.vmem [shape: f32[1,80], index: 4, kind: input, shape index: {}]   ;;  %s1531_s5 = inlined_call_operand.hbm [shape: f32[2,8,80], index: 5, kind: output, shape index: {}]  }
   0x1   :  { %12 = vsyncpa [#allocation3 + $0x1], 0  ;;  %s1065_s18 = smov 0   ;;  %s1067_s19 = smov 0  }
   0x2   :  { %s1069_s20 = smov 0   ;;  %s1071_s21 = smov 0  }
   0x3   :  { %s1073_s22 = smov 0   ;;  %s1075_s23 = smov 0  }
   0x4 LB: > { %s729_s24 = sadd.s32 4294967295, %s1030_s23   ;;  %s730_s25 = sadd.s32 4294967294, %s1030_s23   ;;  %s1030_s23 = sphi %s1075_s23, %s18_s23   ;;  %s1026_s22 = sphi %s1073_s22, %s1540_s22   ;;  %s1022_s21 = sphi %s1071_s21, %s1539_s21   ;;  %s1018_s20 = sphi %s1069_s20, %s1538_s20   ;;  %s1014_s19 = sphi %s1067_s19, %s1537_s19   ;;  %s1010_s18 = sphi %s1065_s18, %s1536_s18  }
   0x5   : > { %s30_s26 = sadd.s32 1, %s1026_s22  ;;  %s156_s27 = sadd.s32 1, %s1018_s20 }
   0x6   : > { %p32_p0 = scmp.ge.s32.totalorder %s30_s26, 2  ;;  %p166_p1 = scmp.ne.s32.totalorder %s1018_s20, %s1014_s19 }
   0x7   : > { %p167_p2 = scmp.eq.s32.totalorder %s729_s24, 1  ;;  %p172_p3 = scmp.ne.s32.totalorder %s1014_s19, %s1010_s18 }
   0x8   : > { %s1542_s26 = smov (%p32_p0, %s30_s26), 0  ;;  %p173_p5 = scmp.eq.s32.totalorder %s730_s25, 1 }
   0x9   : > { %p1105_p4 = por %p167_p2, %p166_p1  ;;  %s151_s29 = ssub.s32 %s1026_s22, %s1542_s26 }
   0xa   : > { %p733_p6 = scmp.ge.s32.totalorder %s1030_s23, 1  ;;  %p154_p7 = scmp.eq.s32.totalorder %s151_s29, 0 }
   0xb   : > { %p1112_p8 = por %p173_p5, %p172_p3  ;;  %p219_p9 = scmp.lt.s32.totalorder %s1030_s23, 3 }
   0xc   : > { %s1118_s6 = scalar_select %p154_p7, %s1018_s20, %s156_s27  }
   0xd   : > { %p220_p10 = pnand %p733_p6, %p219_p9 }
   0xe   : > { %v272_v0 = vld [vmem:[%s1528_s2 + $0x8] sm:$0xff] (!%p220_p10)  ;;  %v274_v1 = vld [vmem:[%s1528_s2 + $0x18] sm:$0xff] (!%p220_p10)  ;;  %v271_v2 = vld [vmem:[%s1528_s2] sm:$0xff] (!%p220_p10)  ;;  %v1032_v12 = vmov (!%p220_p10), 0.0   ;;  %p255_p11 = scmp.lt.s32.totalorder (!%p220_p10), %s1022_s21, 1  ;;  %vm363_vm0 = vcmask (!%p220_p10), 1043456  }
   0xf   : > { %223 = sbr.rel (%p220_p10) target bundleno = 532 (0x214), region = 40  ;;  %v780_v3 = vpack.c.bf16 (!%p220_p10), %v274_v1, %v272_v0  ;;  %v273_v4 = vld [vmem:[%s1528_s2 + $0x10] sm:$0xff] (!%p220_p10)  ;;  %v276_v5 = vld [vmem:[%s1528_s2 + $0x28] sm:$0xff] (!%p220_p10)  ;;  %v278_v6 = vld [vmem:[%s1528_s2 + $0x38] sm:$0xff] (!%p220_p10)  ;;  %505 = vmatprep.mubr.f32.mxu1 (!%p220_p10), %v1032_v12  ;;  %vm1033_vm1 = vmmov (!%p220_p10), 1   ;;  %vm359_vm3 = vcmask (!%p220_p10), 359424  }
  0x10   : > { %v782_v7 = vpack.c.bf16 (!%p220_p10), %v273_v4, %v271_v2  ;;  %v784_v8 = vpack.c.bf16 (!%p220_p10), %v278_v6, %v276_v5  ;;  %v275_v9 = vld [vmem:[%s1528_s2 + $0x20] sm:$0xff] (!%p220_p10)  ;;  %v277_v10 = vld [vmem:[%s1528_s2 + $0x30] sm:$0xff] (!%p220_p10)  ;;  %v280_v11 = vld [vmem:[%s1528_s2 + $0x48] sm:$0xff] (!%p220_p10)  ;;  %s742_s25 = sshll.u32 (!%p220_p10), %s1022_s21, 7  ;;  %vm623_vm4 = vcmask (!%p220_p10), 654336  }
  0x11   : > { %781 = vmatprep.subr.bf16.mxu0 (!%p220_p10), %v780_v3  ;;  %v282_v13 = vld [vmem:[%s1528_s2 + $0x58] sm:$0xff] (!%p220_p10)  ;;  %v786_v14 = vpack.c.bf16 (!%p220_p10), %v277_v10, %v275_v9  ;;  %v279_v16 = vld [vmem:[%s1528_s2 + $0x40] sm:$0xff] (!%p220_p10)  ;;  %v281_v17 = vld [vmem:[%s1528_s2 + $0x50] sm:$0xff] (!%p220_p10)  ;;  %s1479_s9 = scalar_lea.hbm (!%p220_p10), %s1531_s5, %s742_s25 }
  0x12   : > { %783 = vmatpush1.bf16.msra.mxu0 (!%p220_p10), %v782_v7  ;;  %v788_v15 = vpack.c.bf16 (!%p220_p10), %v282_v13, %v280_v11  ;;  %v284_v18 = vld [vmem:[%s1528_s2 + $0x68] sm:$0xff] (!%p220_p10)  ;;  %v286_v19 = vld [vmem:[%s1528_s2 + $0x78] sm:$0xff] (!%p220_p10)  ;;  %v790_v20 = vpack.c.bf16 (!%p220_p10), %v281_v17, %v279_v16  ;;  %v283_v22 = vld [vmem:[%s1528_s2 + $0x60] sm:$0xff] (!%p220_p10) }
  0x13   : > { %785 = vmatprep.subr.bf16.mxu0 (!%p220_p10), %v784_v8  ;;  %v792_v21 = vpack.c.bf16 (!%p220_p10), %v286_v19, %v284_v18  ;;  %v285_v23 = vld [vmem:[%s1528_s2 + $0x70] sm:$0xff] (!%p220_p10)  ;;  %v288_v24 = vld [vmem:[%s1528_s2 + $0x88] sm:$0xff] (!%p220_p10)  ;;  %v290_v25 = vld [vmem:[%s1528_s2 + $0x98] sm:$0xff] (!%p220_p10) }
  0x14   : > { %v794_v26 = vpack.c.bf16 (!%p220_p10), %v285_v23, %v283_v22  ;;  %v796_v27 = vpack.c.bf16 (!%p220_p10), %v290_v25, %v288_v24  ;;  %v287_v28 = vld [vmem:[%s1528_s2 + $0x80] sm:$0xff] (!%p220_p10)  ;;  %v289_v29 = vld [vmem:[%s1528_s2 + $0x90] sm:$0xff] (!%p220_p10)  ;;  %v292_v30 = vld [vmem:[%s1528_s2 + $0xa8] sm:$0xff] (!%p220_p10) }
  0x15   : > { %v294_v31 = vld [vmem:[%s1528_s2 + $0xb8] sm:$0xff] (!%p220_p10)  ;;  %v798_v32 = vpack.c.bf16 (!%p220_p10), %v289_v29, %v287_v28  ;;  %v291_v34 = vld [vmem:[%s1528_s2 + $0xa0] sm:$0xff] (!%p220_p10)  ;;  %v293_v35 = vld [vmem:[%s1528_s2 + $0xb0] sm:$0xff] (!%p220_p10) }
  0x16   : > { %787 = vmatpush1.bf16.msra.mxu0 %v786_v14  ;;  %s1188_s29 = scalar_select %p255_p11, %s1022_s21, 1  ;;  %v800_v33 = vpack.c.bf16 %v294_v31, %v292_v30  ;;  %v296_v36 = vld [vmem:[%s1528_s2 + $0xc8] sm:$0xff]  ;;  %v298_v37 = vld [vmem:[%s1528_s2 + $0xd8] sm:$0xff]  ;;  %v335_v40 = vld [vmem:[%s1528_s2 + $0x200] sm:$0xff]  ;;  %v802_v42 = vpack.c.bf16 %v293_v35, %v291_v34 }
  0x17   : > { %789 = vmatprep.subr.bf16.mxu0 %v788_v15  ;;  %v336_v38 = vld [vmem:[%s1528_s2 + $0x208] sm:$0xff]  ;;  %v338_v39 = vld [vmem:[%s1528_s2 + $0x218] sm:$0xff]  ;;  %v337_v41 = vld [vmem:[%s1528_s2 + $0x210] sm:$0xff]  ;;  %v804_v47 = vpack.c.bf16 %v298_v37, %v296_v36  ;;  %s1034_s21 = smov [#allocation2]  }
  0x18   : > { %s894_s17 = smul.u32 24, %s1188_s29  ;;  %v295_v43 = vld [vmem:[%s1528_s2 + $0xc0] sm:$0xff]  ;;  %v297_v44 = vld [vmem:[%s1528_s2 + $0xd0] sm:$0xff]  ;;  %v844_v45 = vpack.c.bf16 %v338_v39, %v336_v38  ;;  %v846_v46 = vpack.c.bf16 %v337_v41, %v335_v40  ;;  %v300_v48 = vld [vmem:[%s1528_s2 + $0xe8] sm:$0xff]  ;;  %s736_s11 = sshll.u32 %s1188_s29, 1 }
  0x19   : > { %v340_v49 = vld [vmem:[%s1528_s2 + $0x228] sm:$0xff]  ;;  %v342_v50 = vld [vmem:[%s1528_s2 + $0x238] sm:$0xff]  ;;  %v339_v53 = vld [vmem:[%s1528_s2 + $0x220] sm:$0xff]  ;;  %v806_v58 = vpack.c.bf16 %v297_v44, %v295_v43  ;;  %s267_s14 = scalar_lea.vmem %s1527_s1, %s736_s11  ;;  %s252_s29 = sand.u32 1, %s1014_s19  }
  0x1a   : > { %791 = vmatpush1.bf16.msra.mxu0 %v790_v20  ;;  %v302_v51 = vld [vmem:[%s1528_s2 + $0xf8] sm:$0xff]  ;;  %845 = vmatprep.subr.bf16.mxu1 %v844_v45  ;;  %v848_v52 = vpack.c.bf16 %v342_v50, %v340_v49  ;;  %v341_v54 = vld [vmem:[%s1528_s2 + $0x230] sm:$0xff]  ;;  %s1242_s15 = scalar_lea.vmem %s1526_s0, %s894_s17  ;;  %v299_v55 = vld [vmem:[%s1528_s2 + $0xe0] sm:$0xff]  ;;  %s734_s16 = sshll.u32 %s252_s29, 3 }
  0x1b   : > { %793 = vmatprep.subr.bf16.mxu0 %v792_v21  ;;  %v301_v56 = vld [vmem:[%s1528_s2 + $0xf0] sm:$0xff]  ;;  %847 = vmatpush1.bf16.msra.mxu1 %v846_v46  ;;  %v850_v57 = vpack.c.bf16 %v341_v54, %v339_v53  ;;  %v344_v59 = vld [vmem:[%s1528_s2 + $0x248] sm:$0xff]  ;;  %v346_v60 = vld [vmem:[%s1528_s2 + $0x258] sm:$0xf]  ;;  %v808_v62 = vpack.c.bf16 %v302_v51, %v300_v48  ;;  %s254_s27 = scalar_lea.vmem [#allocation2], %s734_s16  ;;  %s626_s10 = scalar_lea.sflag [#allocation3], %s252_s29 }
  0x1c   : > { %849 = vmatprep.subr.bf16.mxu1 %v848_v52  ;;  %vm1257_vm2 = vmpackc.low %vm363_vm0, %vm1033_vm1  ;;  %v852_v63 = vpack.c.bf16 %v346_v60, %v344_v59  ;;  %v343_v0 = vld [vmem:[%s1528_s2 + $0x240] sm:$0xff]  ;;  %v345_v1 = vld [vmem:[%s1528_s2 + $0x250] sm:$0xf]  ;;  %v810_v8 = vpack.c.bf16 %v301_v56, %v299_v55  ;;  %s640_s7 = sshll.u32 %s254_s27, 4  ;;  %s956_s12 = sshll.u32 %s1034_s21, 4  ;;  %s1481_s7 = int_to_ptr.vmem [resolvable:$true] %s640_s7  ;;  %s957_s12 = int_to_ptr.vmem [resolvable:$false] %s956_s12 }
  0x1d   : > { %v269_v2 = vld [vmem:[%s1242_s15 + $0x8] sm:$0xff]  ;;  %v306_v4 = vld [vmem:[%s1528_s2 + $0x118] sm:$0xff]  ;;  %v530_v5 = vld [vmem:[%s1529_s3 + $0x80] sm:$0xff]  ;;  %v855_v6 = vpack.c.bf16 %v345_v1, %v343_v0  ;;  %s952_s11 = scalar_lea.vmem %s1481_s7, 128  ;;  %s958_s13 = scalar_lea.vmem %s957_s12, 256 }
  0x1e   : > { %795 = vmatpush1.bf16.msra.mxu0 %v794_v26  ;;  %v304_v3 = vld [vmem:[%s1528_s2 + $0x108] sm:$0xff]  ;;  %434 = vmatprep.mubr.f32.mxu0 %v269_v2  ;;  %v303_v9 = vld [vmem:[%s1528_s2 + $0x100] sm:$0xff]  ;;  %v305_v14 = vld [vmem:[%s1528_s2 + $0x110] sm:$0xff]  ;;  %p953_p12 = scmp.ne.s32.totalorder %s1481_s7, %s952_s11  ;;  %p959_p1 = scmp.lt.s32.totalorder %s1481_s7, %s957_s12 }
  0x1f   : > { %797 = vmatprep.subr.bf16.mxu0 %v796_v27  ;;  %851 = vmatpush1.bf16.msra.mxu1 %v850_v57  ;;  %v531_v7 = vld [vmem:[%s1529_s3 + $0x88] sm:$0xff]  ;;  %v514_v11 = vld [vmem:[%s1529_s3] sm:$0xff]  ;;  %v812_v13 = vpack.c.bf16 %v306_v4, %v304_v3  ;;  %v532_v15 = vld [vmem:[%s1529_s3 + $0x90] sm:$0xff]  ;;  %v814_v21 = vpack.c.bf16 %v305_v14, %v303_v9  ;;  %p960_p2 = scmp.lt.s32.totalorder %s958_s13, %s952_s11 }
  0x20   : > { %854 = vmatprep.subr.msk.bf16.mxu1 %vm1257_vm2, %v852_v63  ;;  %v858_v10 = vpack.c.bf16 %v531_v7, %v530_v5  ;;  %v515_v12 = vld [vmem:[%s1529_s3 + $0x8] sm:$0xff]  ;;  %v533_v16 = vld [vmem:[%s1529_s3 + $0x98] sm:$0xff]  ;;  %v270_v19 = vld [vmem:[%s1242_s15 + $0x10] sm:$0xff]  ;;  %p954_p13 = pnand %p953_p12, %p1105_p4 }
  0x21   : > { %v308_v17 = vld [vmem:[%s1528_s2 + $0x128] sm:$0xff]  ;;  %v310_v18 = vld [vmem:[%s1528_s2 + $0x138] sm:$0xff]  ;;  %v860_v20 = vpack.c.bf16 %v515_v12, %v514_v11  ;;  %v307_v22 = vld [vmem:[%s1528_s2 + $0x120] sm:$0xff]  ;;  %v862_v23 = vpack.c.bf16 %v533_v16, %v532_v15  ;;  %p961_p3 = por %p960_p2, %p959_p1 }
  0x22   : > { %799 = vmatpush1.bf16.msra.mxu0 %v798_v32  ;;  %v516_v24 = vld [vmem:[%s1529_s3 + $0x10] sm:$0xff]  ;;  %v517_v25 = vld [vmem:[%s1529_s3 + $0x18] sm:$0xff]  ;;  %v816_v26 = vpack.c.bf16 %v310_v18, %v308_v17  ;;  %v534_v28 = vld [vmem:[%s1529_s3 + $0xa0] sm:$0xff]  ;;  %p955_p0 = pneg %p954_p13 }
  0x23   : > { %801 = vmatprep.subr.bf16.mxu0 %v800_v33  ;;  %857 = vmatpush1.bf16.msk.msra.mxu1 %vm1257_vm2, %v855_v6  ;;  %v309_v27 = vld [vmem:[%s1528_s2 + $0x130] sm:$0xff]  ;;  %v535_v29 = vld [vmem:[%s1529_s3 + $0xa8] sm:$0xff]  ;;  %v314_v31 = vld [vmem:[%s1528_s2 + $0x158] sm:$0xff]  ;;  %v864_v32 = vpack.c.bf16 %v517_v25, %v516_v24 }
  0x24   : > { %859 = vmatprep.subr.bf16.mxu1 %v858_v10  ;;  %v312_v30 = vld [vmem:[%s1528_s2 + $0x148] sm:$0xff]  ;;  %v818_v33 = vpack.c.bf16 %v309_v27, %v307_v22  ;;  %v311_v34 = vld [vmem:[%s1528_s2 + $0x140] sm:$0xff]  ;;  %v866_v35 = vpack.c.bf16 %v535_v29, %v534_v28  ;;  %v313_v39 = vld [vmem:[%s1528_s2 + $0x150] sm:$0xff]  ;;  %p962_p5 = pnand %p961_p3, %p955_p0 }
  0x25   : > { %v518_v36 = vld [vmem:[%s1529_s3 + $0x20] sm:$0xff]  ;;  %v519_v37 = vld [vmem:[%s1529_s3 + $0x28] sm:$0xff]  ;;  %v820_v38 = vpack.c.bf16 %v314_v31, %v312_v30  ;;  %v536_v40 = vld [vmem:[%s1529_s3 + $0xb0] sm:$0xff]  ;;  %v822_v45 = vpack.c.bf16 %v313_v39, %v311_v34 }
  0x26   : > { %803 = vmatpush1.bf16.msra.mxu0 %v802_v42  ;;  %739 = vmatmul.mubr.msk.f32.vlgmr.msra.gmra.mrb[0].mxu1 %vm359_vm3, %v270_v19  ;;  %v537_v41 = vld [vmem:[%s1529_s3 + $0xb8] sm:$0xff]  ;;  %v316_v42 = vld [vmem:[%s1528_s2 + $0x168] sm:$0xff]  ;;  %v868_v44 = vpack.c.bf16 %v519_v37, %v518_v36  ;;  %v315_v46 = vld [vmem:[%s1528_s2 + $0x160] sm:$0xff] }
  0x27   : > { %805 = vmatprep.subr.bf16.mxu0 %v804_v47  ;;  %861 = vmatpush3.bf16.msra.mxu1 %v860_v20  ;;  %v318_v43 = vld [vmem:[%s1528_s2 + $0x178] sm:$0xff]  ;;  %v870_v47 = vpack.c.bf16 %v537_v41, %v536_v40  ;;  %v520_v48 = vld [vmem:[%s1529_s3 + $0x30] sm:$0xff]  ;;  %v538_v52 = vld [vmem:[%s1529_s3 + $0xc0] sm:$0xff]  ;;  %v349_v41 = vlaneseq }
  0x28   : > { %863 = vmatprep.subr.bf16.mxu1 %v862_v23  ;;  %v521_v49 = vld [vmem:[%s1529_s3 + $0x38] sm:$0xff]  ;;  %v824_v50 = vpack.c.bf16 %v318_v43, %v316_v42  ;;  %v317_v51 = vld [vmem:[%s1528_s2 + $0x170] sm:$0xff]  ;;  %v539_v53 = vld [vmem:[%s1529_s3 + $0xc8] sm:$0xff] }
  0x29   : > { %v320_v54 = vld [vmem:[%s1528_s2 + $0x188] sm:$0xff]  ;;  %v322_v55 = vld [vmem:[%s1528_s2 + $0x198] sm:$0xff]  ;;  %v872_v56 = vpack.c.bf16 %v521_v49, %v520_v48  ;;  %v826_v57 = vpack.c.bf16 %v317_v51, %v315_v46  ;;  %v874_v59 = vpack.c.bf16 %v539_v53, %v538_v52  ;;  %v522_v60 = vld [vmem:[%s1529_s3 + $0x40] sm:$0xff]  ;;  %v350_v42 = vshrl.u32 %v349_v41, 7 }
  0x2a   : > { %807 = vmatpush1.bf16.msra.mxu0 %v806_v58  ;;  %v319_v58 = vld [vmem:[%s1528_s2 + $0x180] sm:$0xff]  ;;  %v523_v61 = vld [vmem:[%s1529_s3 + $0x48] sm:$0xff]  ;;  %v321_v63 = vld [vmem:[%s1528_s2 + $0x190] sm:$0xff] }
  0x2b   : > { %809 = vmatprep.subr.bf16.mxu0 %v808_v62  ;;  %865 = vmatpush3.bf16.msra.mxu1 %v864_v32  ;;  %v828_v62 = vpack.c.bf16 %v322_v55, %v320_v54  ;;  %v540_v0 = vld [vmem:[%s1529_s3 + $0xd0] sm:$0xff]  ;;  %v541_v1 = vld [vmem:[%s1529_s3 + $0xd8] sm:$0xff]  ;;  %v324_v2 = vld [vmem:[%s1528_s2 + $0x1a8] sm:$0xff]  ;;  %v876_v4 = vpack.c.bf16 %v523_v61, %v522_v60  ;;  %v830_v5 = vpack.c.bf16 %v321_v63, %v319_v58  ;;  %v351_v43 = vsub.s32 0, %v350_v42 }
  0x2c   : > { %867 = vmatprep.subr.bf16.mxu1 %v866_v35  ;;  %v326_v3 = vld [vmem:[%s1528_s2 + $0x1b8] sm:$0xff]  ;;  %v878_v6 = vpack.c.bf16 %v541_v1, %v540_v0  ;;  %v524_v7 = vld [vmem:[%s1529_s3 + $0x50] sm:$0xff]  ;;  %v323_v10 = vld [vmem:[%s1528_s2 + $0x1a0] sm:$0xff] }
  0x2d   : > { %v832_v9 = vpack.c.bf16 %v326_v3, %v324_v2  ;;  %v325_v11 = vld [vmem:[%s1528_s2 + $0x1b0] sm:$0xff]  ;;  %v328_v12 = vld [vmem:[%s1528_s2 + $0x1c8] sm:$0xff]  ;;  %v327_v17 = vld [vmem:[%s1528_s2 + $0x1c0] sm:$0xff] }
  0x2e   : > { %811 = vmatpush1.bf16.msra.mxu0 %v810_v8  ;;  %v525_v8 = vld [vmem:[%s1529_s3 + $0x58] sm:$0xff]  ;;  %v834_v15 = vpack.c.bf16 %v325_v11, %v323_v10  ;;  %v329_v18 = vld [vmem:[%s1528_s2 + $0x1d0] sm:$0xff]  ;;  %v332_v19 = vld [vmem:[%s1528_s2 + $0x1e8] sm:$0xff] }
  0x2f   : > { %813 = vmatprep.subr.bf16.mxu0 %v812_v13  ;;  %869 = vmatpush3.bf16.msra.mxu1 %v868_v44  ;;  %v330_v13 = vld [vmem:[%s1528_s2 + $0x1d8] sm:$0xff]  ;;  %v880_v14 = vpack.c.bf16 %v525_v8, %v524_v7  ;;  %v331_v23 = vld [vmem:[%s1528_s2 + $0x1e0] sm:$0xff]  ;;  %v333_v24 = vld [vmem:[%s1528_s2 + $0x1f0] sm:$0xff] }
  0x30   : > { %871 = vmatprep.subr.bf16.mxu1 %v870_v47  ;;  %v836_v16 = vpack.c.bf16 %v330_v13, %v328_v12  ;;  %v334_v20 = vld [vmem:[%s1528_s2 + $0x1f8] sm:$0xff]  ;;  %v842_v25 = vpack.c.bf16 %v333_v24, %v331_v23  ;;  %v542_v27 = vld [vmem:[%s1529_s3 + $0xe0] sm:$0xff]  ;;  %v543_v28 = vld [vmem:[%s1529_s3 + $0xe8] sm:$0xff] }
  0x31   : > { %v840_v22 = vpack.c.bf16 %v334_v20, %v332_v19  ;;  %v882_v29 = vpack.c.bf16 %v543_v28, %v542_v27  ;;  %v526_v30 = vld [vmem:[%s1529_s3 + $0x60] sm:$0xff]  ;;  %v527_v31 = vld [vmem:[%s1529_s3 + $0x68] sm:$0xff]  ;;  %v545_v34 = vld [vmem:[%s1529_s3 + $0xf8] sm:$0xff] }
  0x32   : > { %815 = vmatpush1.bf16.msra.mxu0 %v814_v21  ;;  %v838_v21 = vpack.c.bf16 %v329_v18, %v327_v17  ;;  %v884_v32 = vpack.c.bf16 %v527_v31, %v526_v30  ;;  %v528_v36 = vld [vmem:[%s1529_s3 + $0x70] sm:$0xff]  ;;  %v529_v37 = vld [vmem:[%s1529_s3 + $0x78] sm:$0xff]  ;;  %v347_v44 = vld [vmem:[%s267_s14] sm:$0x3] }
  0x33   : > { %817 = vmatprep.subr.bf16.mxu0 %v816_v26  ;;  %873 = vmatpush3.bf16.msra.mxu1 %v872_v56  ;;  %v268_v26 = vld [vmem:[%s1242_s15] sm:$0xff]  ;;  %v352_v46 = vrot.slane %v347_v44, %v351_v43 }
  0x34   : > { %875 = vmatprep.subr.bf16.mxu1 %v874_v59 }
  0x36   : > { %819 = vmatpush1.bf16.msra.mxu0 %v818_v33  ;;  %v544_v33 = vld [vmem:[%s1529_s3 + $0xf0] sm:$0xff] }
  0x37   : > { %821 = vmatprep.subr.bf16.mxu0 %v820_v38  ;;  %877 = vmatpush3.bf16.msra.mxu1 %v876_v4  ;;  %v886_v35 = vpack.c.bf16 %v545_v34, %v544_v33  ;;  %v888_v38 = vpack.c.bf16 %v529_v37, %v528_v36 }
  0x38   : > { %879 = vmatprep.subr.bf16.mxu1 %v878_v6 }
  0x3a   : > { %823 = vmatpush1.bf16.msra.mxu0 %v822_v45  ;;  %v355_v45 = vsub.s32 1, %v350_v42 }
  0x3b   : > { %825 = vmatprep.subr.bf16.mxu0 %v824_v50  ;;  %881 = vmatpush3.bf16.msra.mxu1 %v880_v14 }
  0x3c   : > { %883 = vmatprep.subr.bf16.mxu1 %v882_v29  ;;  %v356_v47 = vrot.slane %v347_v44, %v355_v45 }
  0x3e   : > { %827 = vmatpush1.bf16.msra.mxu0 %v826_v57  ;;  %v740_v57 = vld [vmem:[%s1530_s4] ss:$0 sm:$0xff] }
  0x3f   : > { %829 = vmatprep.subr.bf16.mxu0 %v828_v62  ;;  %885 = vmatpush3.bf16.msra.mxu1 %v884_v32 }
  0x40   : > { %887 = vmatprep.subr.bf16.mxu1 %v886_v35 }
  0x42   : > { %831 = vmatpush1.bf16.msra.mxu0 %v830_v5 }
  0x43   : > { %833 = vmatprep.subr.bf16.mxu0 %v832_v9  ;;  %889 = vmatpush3.bf16.msra.mxu1 %v888_v38 }
  0x46   : > { %835 = vmatpush1.bf16.msra.mxu0 %v834_v15 }
  0x47   : > { %837 = vmatprep.subr.bf16.mxu0 %v836_v16 }
  0x4a   : > { %839 = vmatpush1.bf16.msra.mxu0 %v838_v21 }
  0x4b   : > { %841 = vmatprep.subr.bf16.mxu0 %v840_v22 }
  0x4e   : > { %843 = vmatpush1.bf16.msra.mxu0 %v842_v25 }
  0x51   : > { %435 = vmatmul.mubr.f32.vlgmr.msra.gmra.mrb[0].mxu0 %v268_v26 }
  0xf9   : > { %v507_v39 = vpop.f32.mrb[0].mxu1 }
  0xfa   : > { %v509_v40 = vpop.f32.mrb[1].mxu1 }
 0x124   : > { %v436_v48 = vpop.f32.mrb[0].mxu0 }
 0x125   : > { %v437_v49 = vadd.f32 %v436_v48, %v352_v46  ;;  %v438_v50 = vpop.f32.mrb[1].mxu0 }
 0x126   : > { %v439_v51 = vadd.f32 %v438_v50, %v356_v47 }
 0x127   : > { %v508_v52 = vadd.f32 %v507_v39, %v437_v49 }
 0x128   : > { %v510_v53 = vadd.f32 %v509_v40, %v439_v51 }
 0x129   : > { %v512_v55 = vmax.f32 %v508_v52, 0.0 }
 0x12a   : > { %v513_v54 = vmax.f32 %v510_v53, 0.0 }
 0x12c   : > { %617 = vmatprep.mubr.f32.mxu1 %v513_v54 }
 0x12d   : > { %618 = vmatmul.mubr.f32.vlgmr.msra.gmra.mrb[2].mxu1 %v512_v55 }
 0x200   : > { %v777_v56 = vpop.f32.mrb[2].mxu1 }
 0x201   : > { %v778_v58 = vpop.f32.mrb[3].mxu1 }
 0x202   : > { %v779_v59 = vadd.f32 %v778_v58, %v777_v56 }
 0x204   : > { %v620_v60 = vadd.f32 %v779_v59, %v740_v57 }
 0x206   : > { %624 = vst.msk [vmem:[%s254_s27] sm:$0xff] %vm623_vm4, %v620_v60 }
 0x207   : > { %965 = shalt.err (!%p962_p5)
}
 0x208   : > { %s966_s14 = scalar_lea.hbm %s1479_s9, 128  ;;  %s970_s24 = scalar_lea.hbm %s1531_s5, 256 }
 0x209   : > { %p967_p6 = scmp.ne.s32.totalorder %s1479_s9, %s966_s14  ;;  %p971_p10 = scmp.lt.u32.totalorder %s1479_s9, %s1531_s5 }
 0x20a   : > { %p972_p11 = scmp.lt.u32.totalorder %s970_s24, %s966_s14  ;;  %p974_p13 = scmp.lt.u32.totalorder %s966_s14, %s1479_s9 }
 0x20b   : > { %p968_p7 = pnand %p967_p6, %p1105_p4 }
 0x20c   : > { %p973_p12 = por %p972_p11, %p971_p10 }
 0x20d   : > { %p969_p9 = pneg %p968_p7 }
 0x20e   : > { %p975_p0 = por %p974_p13, %p973_p12 }
 0x210   : > { %p976_p1 = pnand %p975_p0, %p969_p9 }
 0x212   : > { %979 = shalt.err (!%p976_p1)
}
 0x213   : > { %895 = dma.vmem_to_hbm [thread:$0]  (%p1105_p4), %s1481_s7, 128, %s1479_s9, %s626_s10  }
 0x214 PF: > { %p901_p2 = scmp.ge.s32.totalorder %s1030_s23, 2  ;;  %s652_s27 = sand.u32 1, %s1010_s18  }
 0x215   : > { %s653_s8 = scalar_lea.sflag [#allocation3], %s652_s27 }
 0x216   : > { %p898_p3 = pnand %p901_p2, %p1112_p8 }
 0x218   : > { %1005 = dma.done.wait (!%p898_p3), %s653_s8, 128  }
 0x219   : > { %1007 = vsyncadd (!%p898_p3), %s653_s8, 4294967168  ;;  %s18_s23 = sadd.s32 1, %s1030_s23   ;;  %s1536_s18 = smov %s1014_s19 }
 0x21a   : > { %p15_p5 = scmp.ge.s32.totalorder %s18_s23, 4   ;;  %s1537_s19 = smov %s1018_s20 }
 0x21b   : > { %s1538_s20 = smov %s1118_s6  ;;  %s1539_s21 = smov %s1026_s22 }
 0x21c   : > { %s1540_s22 = smov %s1542_s26  ;;  %17 = sbr.rel (!%p15_p5) target bundleno = 4 (0x4), region = 78 }
 0x223   :  { %658 = vsyncpa [#allocation3], 1 }
 0x224   :  { %660 = vsyncpa [#allocation3 + $0x1], 1 }

</bundles_post_ra>
